<compile_context>
chip_gen: v5e
topology: v5e:2x2
jax: 0.10.0
libtpu: 0.0.40
codegen_flags: <defaults>
</compile_context>

<pallas_src>
import jax
import jax.numpy as jnp
from jax.experimental import pallas as pl
from jax.experimental.pallas import tpu as pltpu


def _round_up(v: int, m: int) -> int:
    return ((v + m - 1) // m) * m


def _cdiv(a: int, b: int) -> int:
    return (a + b - 1) // b


def _make_mlp_kernel(num_linear: int, out_dim: int):
    """Kernel fusing `num_linear` Linear layers with ReLU in between (static unroll)."""

    def kernel(*refs):
        # refs = (x_ref, w0, b0, w1, b1, ..., o_ref)
        x_ref = refs[0]
        o_ref = refs[-1]
        param_refs = refs[1:-1]

        # (tb, in_dim) f32 input tile -> bf16 for the MXU.
        h = x_ref[...].astype(jnp.bfloat16)
        for i in range(num_linear):
            w = param_refs[2 * i][...]        # bf16 weights, VMEM-resident
            b = param_refs[2 * i + 1][...]    # f32 (1, pout) bias, VMEM-resident
            acc = jnp.dot(h, w, preferred_element_type=jnp.float32)  # MXU, f32 acc
            acc = acc + b                     # bias-add in f32 (VPU)
            if i < num_linear - 1:
                acc = jnp.maximum(acc, 0.0)   # ReLU in f32 (VPU)
                h = acc.astype(jnp.bfloat16)  # back to bf16 for next MXU matmul
            else:
                h = acc
        # Narrow store: only the real output lanes go back to HBM.
        o_ref[...] = h[:, :out_dim].astype(o_ref.dtype)

    return kernel


def prepare_params(params):
    """One-time preparation (hoisted out of the per-step forward).

    params: list of (W, b) with W (in, out) and b (1, out) — already W^T vs PyTorch.
    Output feature dims are zero-padded to multiples of 128 and weights are cast to
    bf16. Padded weight rows / bias lanes are zero, so padded lanes stay exactly zero.
    """
    outs = [w.shape[1] for w, _ in params]
    in_dim = params[0][0].shape[0]
    pouts = [_round_up(d, 128) for d in outs]
    # First layer's contraction dim stays at the natural in_dim (full-array block is
    # legal); later layers consume the previous layer's 128-padded output.
    pins = [in_dim] + pouts[:-1]

    flat = []
    for li, (w, b) in enumerate(params):
        pin, pout = pins[li], pouts[li]
        b2 = b.reshape(1, -1)
        wp = jnp.zeros((pin, pout), jnp.float32).at[: w.shape[0], : w.shape[1]].set(w)
        bp = jnp.zeros((1, pout), jnp.float32).at[:, : b2.shape[1]].set(b2)
        flat.extend([wp.astype(jnp.bfloat16), bp])

    return {
        "flat": tuple(flat),
        "num_linear": len(params),
        "in_dim": in_dim,
        "out_dim": outs[-1],
        "pouts": tuple(pouts),
    }


def rnd_model_forward(x, prep, *, block_batch: int = 1024):
    """Forward pass of RNDModel.

    x: (B, input_dim) f32, unpadded.
    prep: output of prepare_params().
    """
    flat = prep["flat"]
    num_linear = prep["num_linear"]
    in_dim = prep["in_dim"]
    out_dim = prep["out_dim"]
    pouts = prep["pouts"]

    B = x.shape[0]
    assert x.shape[1] == in_dim

    # Batch tile: multiple of 16 (bf16 packed sublanes), capped by block_batch and
    # small enough that the "parallel" grid axis has >=2 (up to 8) steps for v7x.
    pB16 = _round_up(B, 16)
    tb = _round_up(min(block_batch, B), 16)
    max_steps = max(1, pB16 // 16)
    target_steps = min(8, max_steps)
    if target_steps > 1:
        tb = min(tb, _round_up(_cdiv(pB16, target_steps), 16))
    pB = _round_up(B, tb)
    grid = (pB // tb,)

    if pB > B:
        x = jnp.pad(x, ((0, pB - B), (0, 0)))  # rows only; padded rows sliced off below

    # Specs: x / out streamed per batch tile (double-buffered); weights & biases are
    # VMEM-resident (constant index_map) and single-buffered (Buffered(1)).
    in_specs = [pl.BlockSpec((tb, in_dim), lambda i: (i, 0))]
    for li in range(num_linear):
        w, b = flat[2 * li], flat[2 * li + 1]
        in_specs.append(pl.BlockSpec(w.shape, lambda i: (0, 0),
                                     pipeline_mode=pl.Buffered(1)))
        in_specs.append(pl.BlockSpec(b.shape, lambda i: (0, 0),
                                     pipeline_mode=pl.Buffered(1)))
    out_spec = pl.BlockSpec((tb, out_dim), lambda i: (i, 0))

    # VMEM budget: 2x-buffered x/out tiles + single-buffered weights/biases + a few
    # activation-sized f32 temporaries, with 2x margin; capped at 48 MiB so a v7x
    # TensorCore (64 MiB physical) keeps headroom for compiler-internal scratch.
    weight_bytes = 0
    for li in range(num_linear):
        w, b = flat[2 * li], flat[2 * li + 1]
        weight_bytes += w.shape[0] * w.shape[1] * 2 + b.shape[0] * b.shape[1] * 4
    stream_bytes = 2 * tb * in_dim * 4 + 2 * tb * out_dim * 4
    act_bytes = 4 * tb * max(pouts) * 4
    vmem_limit = min(48 * 1024 * 1024,
                     max(32 * 1024 * 1024,
                         2 * (weight_bytes + stream_bytes + act_bytes)))

    kernel = _make_mlp_kernel(num_linear, out_dim)

    out = pl.pallas_call(
        kernel,
        out_shape=jax.ShapeDtypeStruct((pB, out_dim), jnp.float32),
        grid_spec=pltpu.PrefetchScalarGridSpec(
            num_scalar_prefetch=0,
            grid=grid,
            in_specs=in_specs,
            out_specs=out_spec,
        ),
        compiler_params=pltpu.CompilerParams(
            dimension_semantics=("parallel",),   # shard batch tiles across TCs (v7x)
            vmem_limit_bytes=int(vmem_limit),
        ),
    )(x, *flat)

    return out[:B]


def init_rnd_params(key, input_dim, hidden_size, output_dim, n_layers=2):
    """Deterministic PyTorch-style (uniform +/- 1/sqrt(fan_in)) Linear init."""
    dims = [input_dim] + [hidden_size] * n_layers + [output_dim]
    params = []
    for i in range(len(dims) - 1):
        fan_in, fan_out = dims[i], dims[i + 1]
        key, kw, kb = jax.random.split(key, 3)
        bound = 1.0 / jnp.sqrt(jnp.float32(fan_in))
        w = jax.random.uniform(kw, (fan_in, fan_out), jnp.float32, -bound, bound)
        b = jax.random.uniform(kb, (1, fan_out), jnp.float32, -bound, bound)
        params.append((w, b))
    return params


def rnd_model_ref(x, params):
    """Plain-JAX f32 reference for correctness checking."""
    h = x
    for i, (w, b) in enumerate(params):
        h = h @ w + b
        if i < len(params) - 1:
            h = jnp.maximum(h, 0.0)
    return h


if __name__ == "__main__":
    input_dim, hidden_size, output_dim, n_layers = 16, 32, 8, 2
    batch = 32

    key = jax.random.PRNGKey(0)
    key, kx = jax.random.split(key)
    x = jax.random.normal(kx, (batch, input_dim), dtype=jnp.float32)

    params = init_rnd_params(key, input_dim, hidden_size, output_dim, n_layers)
    prep = prepare_params(params)   # one-time pad + bf16 cast, hoisted out of forward

    # With B=32 the tile logic picks tb=16 -> a 2-step, pipelined "parallel" grid.
    out = rnd_model_forward(x, prep)
    out = jax.block_until_ready(out)

    ref = rnd_model_ref(x, params)
    assert out.shape == (batch, output_dim)
    # bf16 matmul inputs with f32 accumulation -> loosened tolerance vs f32 reference.
    assert jnp.allclose(out, ref, atol=2e-2, rtol=2e-2), "mismatch vs reference"

    print("KERNEL_OK")
</pallas_src>

<mosaic_0001>
module attributes {stable_mosaic.version = 11 : i64} {
  func.func @kernel(%arg0: i32, %arg1: memref<16x16xf32, #tpu.memory_space<vmem>>, %arg2: memref<16x128xbf16, #tpu.memory_space<vmem>>, %arg3: memref<1x128xf32, #tpu.memory_space<vmem>>, %arg4: memref<128x128xbf16, #tpu.memory_space<vmem>>, %arg5: memref<1x128xf32, #tpu.memory_space<vmem>>, %arg6: memref<128x128xbf16, #tpu.memory_space<vmem>>, %arg7: memref<1x128xf32, #tpu.memory_space<vmem>>, %arg8: memref<16x8xf32, #tpu.memory_space<vmem>>) attributes {dimension_semantics = [#tpu.dimension_semantics<parallel>], iteration_bounds = array<i64: 2>, scalar_prefetch = 0 : i64, scratch_operands = 0 : i64, tpu.core_type = #tpu.core_type<tc>, window_params = [{transform_indices = @transform_0, window_bounds = array<i64: 16, 16>}, {pipeline_mode = #tpu.pipeline_mode<synchronous>, transform_indices = @transform_1, window_bounds = array<i64: 16, 128>}, {pipeline_mode = #tpu.pipeline_mode<synchronous>, transform_indices = @transform_2, window_bounds = array<i64: 1, 128>}, {pipeline_mode = #tpu.pipeline_mode<synchronous>, transform_indices = @transform_3, window_bounds = array<i64: 128, 128>}, {pipeline_mode = #tpu.pipeline_mode<synchronous>, transform_indices = @transform_4, window_bounds = array<i64: 1, 128>}, {pipeline_mode = #tpu.pipeline_mode<synchronous>, transform_indices = @transform_5, window_bounds = array<i64: 128, 128>}, {pipeline_mode = #tpu.pipeline_mode<synchronous>, transform_indices = @transform_6, window_bounds = array<i64: 1, 128>}, {transform_indices = @transform_7, window_bounds = array<i64: 16, 8>}]} {
    %c0 = arith.constant 0 : index
    %c0_0 = arith.constant 0 : index
    %0 = vector.load %arg1[%c0, %c0_0] : memref<16x16xf32, #tpu.memory_space<vmem>>, vector<16x16xf32>
    %1 = arith.truncf %0 : vector<16x16xf32> to vector<16x16xbf16>
    %c0_1 = arith.constant 0 : index
    %c0_2 = arith.constant 0 : index
    %2 = vector.load %arg2[%c0_1, %c0_2] : memref<16x128xbf16, #tpu.memory_space<vmem>>, vector<16x128xbf16>
    %c0_3 = arith.constant 0 : index
    %c0_4 = arith.constant 0 : index
    %3 = vector.load %arg3[%c0_3, %c0_4] : memref<1x128xf32, #tpu.memory_space<vmem>>, vector<1x128xf32>
    %cst = arith.constant dense<0.000000e+00> : vector<16x128xf32>
    %4 = tpu.matmul %1, %2, %cst {dimension_numbers = #tpu.dot_dimension_numbers<[1], [0], [0], [1], [0, 0, 1, 1], [], []>} : vector<16x16xbf16>, vector<16x128xbf16>, vector<16x128xf32> -> vector<16x128xf32>
    %5 = vector.broadcast %3 : vector<1x128xf32> to vector<16x128xf32>
    %6 = arith.addf %4, %5 : vector<16x128xf32>
    %cst_5 = arith.constant 0.000000e+00 : f32
    %7 = vector.broadcast %cst_5 : f32 to vector<16x128xf32>
    %8 = arith.maximumf %6, %7 : vector<16x128xf32>
    %9 = arith.truncf %8 : vector<16x128xf32> to vector<16x128xbf16>
    %c0_6 = arith.constant 0 : index
    %c0_7 = arith.constant 0 : index
    %10 = vector.load %arg4[%c0_6, %c0_7] : memref<128x128xbf16, #tpu.memory_space<vmem>>, vector<128x128xbf16>
    %c0_8 = arith.constant 0 : index
    %c0_9 = arith.constant 0 : index
    %11 = vector.load %arg5[%c0_8, %c0_9] : memref<1x128xf32, #tpu.memory_space<vmem>>, vector<1x128xf32>
    %cst_10 = arith.constant dense<0.000000e+00> : vector<16x128xf32>
    %12 = tpu.matmul %9, %10, %cst_10 {dimension_numbers = #tpu.dot_dimension_numbers<[1], [0], [0], [1], [0, 0, 1, 1], [], []>} : vector<16x128xbf16>, vector<128x128xbf16>, vector<16x128xf32> -> vector<16x128xf32>
    %13 = vector.broadcast %11 : vector<1x128xf32> to vector<16x128xf32>
    %14 = arith.addf %12, %13 : vector<16x128xf32>
    %cst_11 = arith.constant 0.000000e+00 : f32
    %15 = vector.broadcast %cst_11 : f32 to vector<16x128xf32>
    %16 = arith.maximumf %14, %15 : vector<16x128xf32>
    %17 = arith.truncf %16 : vector<16x128xf32> to vector<16x128xbf16>
    %c0_12 = arith.constant 0 : index
    %c0_13 = arith.constant 0 : index
    %18 = vector.load %arg6[%c0_12, %c0_13] : memref<128x128xbf16, #tpu.memory_space<vmem>>, vector<128x128xbf16>
    %c0_14 = arith.constant 0 : index
    %c0_15 = arith.constant 0 : index
    %19 = vector.load %arg7[%c0_14, %c0_15] : memref<1x128xf32, #tpu.memory_space<vmem>>, vector<1x128xf32>
    %cst_16 = arith.constant dense<0.000000e+00> : vector<16x128xf32>
    %20 = tpu.matmul %17, %18, %cst_16 {dimension_numbers = #tpu.dot_dimension_numbers<[1], [0], [0], [1], [0, 0, 1, 1], [], []>} : vector<16x128xbf16>, vector<128x128xbf16>, vector<16x128xf32> -> vector<16x128xf32>
    %21 = vector.broadcast %19 : vector<1x128xf32> to vector<16x128xf32>
    %22 = arith.addf %20, %21 : vector<16x128xf32>
    %23 = vector.extract_strided_slice %22 {offsets = [0, 0], sizes = [16, 8], strides = [1, 1]} : vector<16x128xf32> to vector<16x8xf32>
    %c0_17 = arith.constant 0 : index
    %c0_18 = arith.constant 0 : index
    %24 = vector.load %arg8[%c0_17, %c0_18] : memref<16x8xf32, #tpu.memory_space<vmem>>, vector<16x8xf32>
    tpu.vector_store %arg8[%c0_17, %c0_18], %23 {strides = array<i32>} : memref<16x8xf32, #tpu.memory_space<vmem>>, vector<16x8xf32>,
    return
  }
  func.func @transform_0(%arg0: i32) -> (i32, i32) {
    %c0_i32 = arith.constant 0 : i32
    %c0_i32_0 = arith.constant 0 : i32
    return %arg0, %c0_i32 : i32, i32
  }
  func.func @transform_1(%arg0: i32) -> (i32, i32) {
    %c0_i32 = arith.constant 0 : i32
    %c0_i32_0 = arith.constant 0 : i32
    %c0_i32_1 = arith.constant 0 : i32
    return %c0_i32, %c0_i32_0 : i32, i32
  }
  func.func @transform_2(%arg0: i32) -> (i32, i32) {
    %c0_i32 = arith.constant 0 : i32
    %c0_i32_0 = arith.constant 0 : i32
    %c0_i32_1 = arith.constant 0 : i32
    return %c0_i32, %c0_i32_0 : i32, i32
  }
  func.func @transform_3(%arg0: i32) -> (i32, i32) {
    %c0_i32 = arith.constant 0 : i32
    %c0_i32_0 = arith.constant 0 : i32
    %c0_i32_1 = arith.constant 0 : i32
    return %c0_i32, %c0_i32_0 : i32, i32
  }
  func.func @transform_4(%arg0: i32) -> (i32, i32) {
    %c0_i32 = arith.constant 0 : i32
    %c0_i32_0 = arith.constant 0 : i32
    %c0_i32_1 = arith.constant 0 : i32
    return %c0_i32, %c0_i32_0 : i32, i32
  }
  func.func @transform_5(%arg0: i32) -> (i32, i32) {
    %c0_i32 = arith.constant 0 : i32
    %c0_i32_0 = arith.constant 0 : i32
    %c0_i32_1 = arith.constant 0 : i32
    return %c0_i32, %c0_i32_0 : i32, i32
  }
  func.func @transform_6(%arg0: i32) -> (i32, i32) {
    %c0_i32 = arith.constant 0 : i32
    %c0_i32_0 = arith.constant 0 : i32
    %c0_i32_1 = arith.constant 0 : i32
    return %c0_i32, %c0_i32_0 : i32, i32
  }
  func.func @transform_7(%arg0: i32) -> (i32, i32) {
    %c0_i32 = arith.constant 0 : i32
    %c0_i32_0 = arith.constant 0 : i32
    return %arg0, %c0_i32 : i32, i32
  }
}

</mosaic_0001>

<bundles_post_ra>
// kernel: tpu_custom_call.1
= control target key start
LH: loop header
LB: loop body
LE: loop exit
PB: predicated region body
PF: predicated region fallthrough
CT: control target
= control target key end

     0   :  { %12 = vsyncpa [#allocation3], 0  ;;  %s920_s0 = inlined_call_operand.vmem [shape: f32[32,16], index: 0, kind: input, shape index: {}]   ;;  %s921_s1 = inlined_call_operand.vmem [shape: bf16[16,128], index: 1, kind: input, shape index: {}]   ;;  %s922_s2 = inlined_call_operand.vmem [shape: f32[1,128], index: 2, kind: input, shape index: {}]   ;;  %s923_s3 = inlined_call_operand.hbm [shape: bf16[128,128], index: 3, kind: input, shape index: {}]   ;;  %s924_s4 = inlined_call_operand.vmem [shape: f32[1,128], index: 4, kind: input, shape index: {}]   ;;  %s925_s5 = inlined_call_operand.hbm [shape: bf16[128,128], index: 5, kind: input, shape index: {}]   ;;  %s926_s6 = inlined_call_operand.vmem [shape: f32[1,128], index: 6, kind: input, shape index: {}]   ;;  %s927_s7 = inlined_call_operand.vmem [shape: f32[32,8], index: 7, kind: output, shape index: {}]  }
   0x1   :  { %13 = vsyncpa [#allocation5], 0  ;;  %s856_s24 = smov 0  }
   0x2 LB: > { %s219_s27 = sshll.u32 %s923_s3, 4  ;;  %s601_s28 = sadd.s32 4294967295, %s810_s24   ;;  %s810_s24 = sphi %s856_s24, %s19_s24   ;;  %s220_s27 = int_to_ptr.hbm [resolvable:$true] %s219_s27 }
   0x3   : > { %p603_p0 = scmp.ge.s32.totalorder %s810_s24, 1  ;;  %p202_p1 = scmp.lt.s32.totalorder %s810_s24, 3 }
   0x4   : > { %p867_p2 = scmp.eq.s32.totalorder %s601_s28, 0  ;;  %s812_s8 = smov [#allocation2]  }
   0x5   : > { %p871_p3 = pnand %p603_p0, %p202_p1  ;;  %s221_s9 = sshll.u32 %s812_s8, 4  ;;  %s222_s9 = int_to_ptr.vmem [resolvable:$true] %s221_s9 }
   0x6   : > { %s236_s12 = sshll.u32 %s925_s5, 4  ;;  %s813_s13 = smov [#allocation4]   ;;  %s237_s12 = int_to_ptr.hbm [resolvable:$true] %s236_s12 }
   0x7   : > { %p710_p4 = pneg %p871_p3  ;;  %s238_s14 = sshll.u32 %s813_s13, 4  ;;  %s239_s14 = int_to_ptr.vmem [resolvable:$true] %s238_s14 }
   0x8   : > { %s814_s15 = smov 64   ;;  %s815_s16 = smov 4  }
   0x9   : > { %p711_p5 = pnand %p867_p2, %p710_p4  ;;  %266 = sbr.rel (%p871_p3) target bundleno = 449 (0x1c1), region = 48 }
   0xb   : > { %713 = dma.hbm_to_vmem [thread:$0]  (!%p711_p5), %s220_s27, 1024, %s222_s9, [#allocation3], %s814_s15, %s814_s15, %s815_s16  }
   0xc   : > { %716 = dma.hbm_to_vmem [thread:$0]  (!%p711_p5), %s237_s12, 1024, %s239_s14, [#allocation5], %s814_s15, %s814_s15, %s815_s16  }
   0xe   : > { %801 = dma.done.wait (%p867_p2), [#allocation3], 1024  }
   0xf   : > { %803 = vsyncadd (%p867_p2), [#allocation3], 4294966272 }
  0x10   : > { %805 = dma.done.wait (%p867_p2), [#allocation5], 1024  }
  0x11   : > { %807 = vsyncadd (%p867_p2), [#allocation5], 4294966272  ;;  %s610_s17 = sshll.u32 %s601_s28, 1  ;;  %v685_v0 = vld [vmem:[%s921_s1] sm:$0xff]  ;;  %v693_v4 = vld [vmem:[#allocation2 + $0x38] sm:$0xff]  ;;  %vm332_vm0 = vcmask 130048  }
  0x12   : > { %p305_p6 = scmp.lt.s32.totalorder %s610_s17, 3  ;;  %343 = vmatpush.bf16.msra.mxu0 %v685_v0  ;;  %421 = vmatpush.bf16.msra.mxu1 %v693_v4  ;;  %v692_v5 = vld [vmem:[#allocation2 + $0x30] sm:$0xff]  ;;  %v691_v6 = vld [vmem:[#allocation2 + $0x28] sm:$0xff]  ;;  %v690_v7 = vld [vmem:[#allocation2 + $0x20] sm:$0xff]  ;;  %vm520_vm1 = vcmask 64512  }
  0x13   : > { %v689_v8 = vld [vmem:[#allocation2 + $0x18] sm:$0xff]  ;;  %v688_v9 = vld [vmem:[#allocation2 + $0x10] sm:$0xff]  ;;  %v687_v10 = vld [vmem:[#allocation2 + $0x8] sm:$0xff] }
  0x14   : > { %s931_s17 = smov (!%p305_p6, %s610_s17), 3  ;;  %v686_v11 = vld [vmem:[#allocation2] sm:$0xff]  ;;  %v701_v12 = vld [vmem:[#allocation4 + $0x38] sm:$0xff]  ;;  %v700_v13 = vld [vmem:[#allocation4 + $0x30] sm:$0xff] }
  0x15   : > { %s611_s18 = sshll.u32 %s931_s17, 3  ;;  %506 = vmatpush.bf16.msra.mxu2 %v701_v12  ;;  %v699_v14 = vld [vmem:[#allocation4 + $0x28] sm:$0xff]  ;;  %v698_v15 = vld [vmem:[#allocation4 + $0x20] sm:$0xff]  ;;  %v697_v24 = vld [vmem:[#allocation4 + $0x18] sm:$0xff] }
  0x16   : > { %s308_s21 = scalar_lea.vmem %s920_s0, %s611_s18  ;;  %422 = vmatpush.bf16.msra.mxu1 %v692_v5  ;;  %v733_v17 = vld [vmem:[%s922_s2] ss:$0 sm:$0xff]  ;;  %v696_v25 = vld [vmem:[#allocation4 + $0x10] sm:$0xff]  ;;  %v695_v26 = vld [vmem:[#allocation4 + $0x8] sm:$0xff]  ;;  %s314_s10 = scalar_lea.vmem %s927_s7, %s611_s18 }
  0x17   : > { %v317_v1 = vld [vmem:[%s308_s21] sm:$0xff]  ;;  %v318_v2 = vld [vmem:[%s308_s21 + $0x8] sm:$0xff] }
  0x18   : > { %v319_v3 = vpack.c.bf16 %v318_v2, %v317_v1  ;;  %v694_v27 = vld [vmem:[#allocation4] sm:$0xff] }
  0x19   : > { %507 = vmatpush.bf16.msra.mxu2 %v700_v13  ;;  %v734_v29 = vld [vmem:[%s924_s4] ss:$0 sm:$0xff] }
  0x1a   : > { %618 = vmatmul.msk.bf16.vlgmr.msra.gmra.mxu0 %vm332_vm0, %v319_v3  ;;  %423 = vmatpush.bf16.msra.mxu1 %v691_v6  ;;  %v735_v36 = vld [vmem:[%s926_s6] ss:$0 sm:$0xff] }
  0x1d   : > { %508 = vmatpush.bf16.msra.mxu2 %v699_v14 }
  0x1e   : > { %424 = vmatpush.bf16.msra.mxu1 %v690_v7 }
  0x21   : > { %509 = vmatpush.bf16.msra.mxu2 %v698_v15 }
  0x22   : > { %425 = vmatpush.bf16.msra.mxu1 %v689_v8 }
  0x25   : > { %510 = vmatpush.bf16.msra.mxu2 %v697_v24 }
  0x26   : > { %426 = vmatpush.bf16.msra.mxu1 %v688_v9 }
  0x29   : > { %511 = vmatpush.bf16.msra.mxu2 %v696_v25 }
  0x2a   : > { %427 = vmatpush.bf16.msra.mxu1 %v687_v10 }
  0x2d   : > { %512 = vmatpush.bf16.msra.mxu2 %v695_v26 }
  0x2e   : > { %428 = vmatpush.bf16.msra.mxu1 %v686_v11 }
  0x31   : > { %513 = vmatpush.bf16.msra.mxu2 %v694_v27 }
  0x97   : > { %v345_v16 = vpop.f32.mrf.mxu0 }
  0x98   : > { %v346_v18 = vadd.f32 %v733_v17, %v345_v16 }
  0x9a   : > { %v350_v21 = vmax.f32 %v346_v18, 0.0 }
  0x9f   : > { %v347_v19 = vpop.f32.mrf.mxu0 }
  0xa0   : > { %v348_v20 = vadd.f32 %v733_v17, %v347_v19 }
  0xa2   : > { %v351_v22 = vmax.f32 %v348_v20, 0.0 }
  0xa4   : > { %v352_v23 = vpack.c.bf16 %v351_v22, %v350_v21 }
  0xa6   : > { %429 = vmatmul.bf16.vlgmr.msra.gmra.mxu1 %v352_v23 }
 0x123   : > { %v430_v28 = vpop.f32.mrf.mxu1 }
 0x124   : > { %v431_v30 = vadd.f32 %v734_v29, %v430_v28 }
 0x126   : > { %v435_v33 = vmax.f32 %v431_v30, 0.0 }
 0x12b   : > { %v432_v31 = vpop.f32.mrf.mxu1 }
 0x12c   : > { %v433_v32 = vadd.f32 %v734_v29, %v432_v31 }
 0x12e   : > { %v436_v34 = vmax.f32 %v433_v32, 0.0 }
 0x130   : > { %v437_v35 = vpack.c.bf16 %v436_v34, %v435_v33 }
 0x132   : > { %514 = vmatmul.bf16.vlgmr.msra.gmra.mxu2 %v437_v35 }
 0x1b5   : > { %v515_v37 = vpop.f32.mrf.mxu2 }
 0x1b6   : > { %v516_v38 = vadd.f32 %v735_v36, %v515_v37 }
 0x1b8   : > { %521 = vst.msk [vmem:[%s314_s10] sm:$0xff] %vm520_vm1, %v516_v38 }
 0x1bd   : > { %v517_v39 = vpop.f32.mrf.mxu2 }
 0x1be   : > { %v518_v40 = vadd.f32 %v735_v36, %v517_v39 }
 0x1c0   : > { %522 = vst.msk [vmem:[%s314_s10 + $0x8] sm:$0xff] %vm520_vm1, %v518_v40 }
 0x1c1 PF: > { %s19_s24 = sadd.s32 1, %s810_s24  }
 0x1c2   : > { %p16_p7 = scmp.ge.s32.totalorder %s19_s24, 4  }
 0x1c4   :  { %18 = sbr.rel (!%p16_p7) target bundleno = 2 (0x2), region = 87 }
 0x1c9   :  { %545 = vsyncpa [#allocation3], 1 }
 0x1ca   :  { %547 = vsyncpa [#allocation3 + $0x1], 1 }
 0x1cb   :  { %548 = vsyncpa [#allocation5], 1 }

</bundles_post_ra>
